<compile_context>
chip_gen: v5e
topology: v5e:2x2
jax: 0.10.0
libtpu: 0.0.40
codegen_flags: <defaults>
</compile_context>

<pallas_src>
import jax
import jax.numpy as jnp
from jax.experimental import pallas as pl
from jax.experimental.pallas import tpu as pltpu


def attention_block_kernel(x_ref, g_ref,
                           wx_ref, bx_ref,
                           wg_ref, bg_ref,
                           wpsi_ref, bpsi_ref,
                           out_ref):
    # Channels-first, lane-dense layout: last dim is the spatial tile TM.
    #   x_ref   : (Cin, TM)      g_ref : (Cg, TM)
    #   wx_ref  : (Ci, Cin)      bx_ref: (Ci, 1)
    #   wg_ref  : (Ci, Cg)       bg_ref: (Ci, 1)
    #   wpsi_ref: (Ci, 1)        bpsi  : (1, 1)
    #   out_ref : (Cin, TM)
    x = x_ref[...].astype(jnp.float32)
    g = g_ref[...].astype(jnp.float32)

    # 1x1 convs == channel matmuls; outputs stay lane-dense along TM (MXU).
    x1 = jnp.dot(wx_ref[...], x, preferred_element_type=jnp.float32) + bx_ref[...]
    g1 = jnp.dot(wg_ref[...], g, preferred_element_type=jnp.float32) + bg_ref[...]

    a = jnp.maximum(g1 + x1, 0.0)                      # (Ci, TM)

    # psi projection (Ci -> 1): lane-wise multiply + sublane reduction
    # (VPU/XLU slots) instead of a wasteful 1-column MXU matmul.
    psi = jnp.sum(a * wpsi_ref[...], axis=0, keepdims=True) + bpsi_ref[...]
    psi = jax.nn.sigmoid(psi)                          # (1, TM)

    # out = x * psi, broadcast over channels.
    out_ref[...] = (x * psi).astype(out_ref.dtype)


def attention_block(x_nchw, g_nchw, params, *, tm=1024):
    """x_nchw: (N, Cin, H, W), g_nchw: (N, Cg, H, W) -- same N, H, W.

    Weights are stored in PyTorch Conv2d (out_channels, in_channels) form
    (1x1 kernel squeezed); biases as column vectors (C_out, 1).
    """
    wx, bx, wg, bg, wpsi, bpsi = params
    N, Cin, H, W = x_nchw.shape
    Cg = g_nchw.shape[1]
    Ci = wx.shape[0]
    HW = H * W

    assert tm % 128 == 0, "spatial tile must be a multiple of 128 lanes"

    # Channels-first flat views (N, C, H*W): no transpose, no HBM round trip.
    x_flat = x_nchw.reshape(N, Cin, HW)
    g_flat = g_nchw.reshape(N, Cg, HW)

    # Lane-dense spatial tile: multiple of 128, capped at (padded) HW.
    tm_eff = min(tm, pl.cdiv(HW, 128) * 128)
    HWp = pl.cdiv(HW, tm_eff) * tm_eff
    if HWp != HW:
        x_flat = jnp.pad(x_flat, ((0, 0), (0, 0), (0, HWp - HW)))
        g_flat = jnp.pad(g_flat, ((0, 0), (0, 0), (0, HWp - HW)))

    grid = (N, HWp // tm_eff)

    def stream_spec(c):
        # N dim squeezed; kernel sees (C, TM) with TM on the lane axis.
        return pl.BlockSpec((None, c, tm_eff), lambda n, j: (n, 0, j))

    def full_spec(r, c):
        return pl.BlockSpec((r, c), lambda n, j: (0, 0))

    out_flat = pl.pallas_call(
        attention_block_kernel,
        out_shape=jax.ShapeDtypeStruct((N, Cin, HWp), x_nchw.dtype),
        grid_spec=pltpu.PrefetchScalarGridSpec(
            num_scalar_prefetch=0,
            grid=grid,
            in_specs=[
                stream_spec(Cin),          # x
                stream_spec(Cg),           # g
                full_spec(Ci, Cin),        # wx
                full_spec(Ci, 1),          # bx
                full_spec(Ci, Cg),         # wg
                full_spec(Ci, 1),          # bg
                full_spec(Ci, 1),          # wpsi
                full_spec(1, 1),           # bpsi
            ],
            out_specs=stream_spec(Cin),
        ),
        compiler_params=pltpu.CompilerParams(
            dimension_semantics=("parallel", "parallel")),
    )(x_flat, g_flat, wx, bx, wg, bg, wpsi, bpsi)

    if HWp != HW:
        out_flat = out_flat[:, :, :HW]
    return out_flat.reshape(N, Cin, H, W)


def init_params(key, in_channels, gating_channels, inter_channels):
    """Deterministic init. Weights in (C_out, C_in) Conv2d-1x1 form; biases (C_out, 1)."""
    k1, k2, k3, k4, k5, k6 = jax.random.split(key, 6)
    wx = jax.random.normal(k1, (inter_channels, in_channels), jnp.float32) * 0.1
    bx = jax.random.normal(k2, (inter_channels, 1), jnp.float32) * 0.1
    wg = jax.random.normal(k3, (inter_channels, gating_channels), jnp.float32) * 0.1
    bg = jax.random.normal(k4, (inter_channels, 1), jnp.float32) * 0.1
    wpsi = jax.random.normal(k5, (inter_channels, 1), jnp.float32) * 0.1
    bpsi = jax.random.normal(k6, (1, 1), jnp.float32) * 0.1
    return wx, bx, wg, bg, wpsi, bpsi


def attention_block_ref(x_nchw, g_nchw, params):
    """Pure-JAX reference matching the PyTorch forward."""
    wx, bx, wg, bg, wpsi, bpsi = params
    N, Cin, H, W = x_nchw.shape
    Cg = g_nchw.shape[1]
    xf = x_nchw.reshape(N, Cin, H * W)
    gf = g_nchw.reshape(N, Cg, H * W)
    x1 = jnp.einsum('oc,ncm->nom', wx, xf) + bx[None]
    g1 = jnp.einsum('oc,ncm->nom', wg, gf) + bg[None]
    a = jax.nn.relu(g1 + x1)
    psi = jax.nn.sigmoid(jnp.einsum('co,ncm->nom', wpsi, a) + bpsi[None])
    out = xf * psi
    return out.reshape(N, Cin, H, W)


if __name__ == "__main__":
    # Small shapes consistent with the module: x is (N, in_ch, H, W),
    # g is (N, gating_ch, H, W), same spatial dims.
    N, Cin, Cg, Ci, H, W = 2, 4, 6, 8, 16, 16

    key = jax.random.PRNGKey(0)
    kx, kg, kp = jax.random.split(key, 3)
    x = jax.random.normal(kx, (N, Cin, H, W), jnp.float32)
    g = jax.random.normal(kg, (N, Cg, H, W), jnp.float32)
    params = init_params(kp, Cin, Cg, Ci)

    out = attention_block(x, g, params)
    out = jax.block_until_ready(out)

    ref = attention_block_ref(x, g, params)
    assert out.shape == (N, Cin, H, W)
    assert jnp.allclose(out, ref, atol=1e-5, rtol=1e-5)

    print("KERNEL_OK")
</pallas_src>

<mosaic_0001>
module attributes {stable_mosaic.version = 11 : i64} {
  func.func @attention_block_kernel(%arg0: i32, %arg1: i32, %arg2: memref<1x4x256xf32, #tpu.memory_space<vmem>>, %arg3: memref<1x6x256xf32, #tpu.memory_space<vmem>>, %arg4: memref<8x4xf32, #tpu.memory_space<vmem>>, %arg5: memref<8x1xf32, #tpu.memory_space<vmem>>, %arg6: memref<8x6xf32, #tpu.memory_space<vmem>>, %arg7: memref<8x1xf32, #tpu.memory_space<vmem>>, %arg8: memref<8x1xf32, #tpu.memory_space<vmem>>, %arg9: memref<1x1xf32, #tpu.memory_space<vmem>>, %arg10: memref<1x4x256xf32, #tpu.memory_space<vmem>>) attributes {dimension_semantics = [#tpu.dimension_semantics<parallel>, #tpu.dimension_semantics<parallel>], iteration_bounds = array<i64: 2, 1>, scalar_prefetch = 0 : i64, scratch_operands = 0 : i64, tpu.core_type = #tpu.core_type<tc>, window_params = [{transform_indices = @transform_0, window_bounds = array<i64: 1, 4, 256>}, {transform_indices = @transform_1, window_bounds = array<i64: 1, 6, 256>}, {pipeline_mode = #tpu.pipeline_mode<synchronous>, transform_indices = @transform_2, window_bounds = array<i64: 8, 4>}, {pipeline_mode = #tpu.pipeline_mode<synchronous>, transform_indices = @transform_3, window_bounds = array<i64: 8, 1>}, {pipeline_mode = #tpu.pipeline_mode<synchronous>, transform_indices = @transform_4, window_bounds = array<i64: 8, 6>}, {pipeline_mode = #tpu.pipeline_mode<synchronous>, transform_indices = @transform_5, window_bounds = array<i64: 8, 1>}, {pipeline_mode = #tpu.pipeline_mode<synchronous>, transform_indices = @transform_6, window_bounds = array<i64: 8, 1>}, {pipeline_mode = #tpu.pipeline_mode<synchronous>, transform_indices = @transform_7, window_bounds = array<i64: 1, 1>}, {transform_indices = @transform_8, window_bounds = array<i64: 1, 4, 256>}]} {
    %c0 = arith.constant 0 : index
    %c0_0 = arith.constant 0 : index
    %c0_1 = arith.constant 0 : index
    %0 = vector.load %arg2[%c0, %c0_0, %c0_1] : memref<1x4x256xf32, #tpu.memory_space<vmem>>, vector<1x4x256xf32>
    %1 = vector.shape_cast %0 : vector<1x4x256xf32> to vector<4x256xf32>
    %c0_2 = arith.constant 0 : index
    %c0_3 = arith.constant 0 : index
    %c0_4 = arith.constant 0 : index
    %2 = vector.load %arg3[%c0_2, %c0_3, %c0_4] : memref<1x6x256xf32, #tpu.memory_space<vmem>>, vector<1x6x256xf32>
    %3 = vector.shape_cast %2 : vector<1x6x256xf32> to vector<6x256xf32>
    %c0_5 = arith.constant 0 : index
    %c0_6 = arith.constant 0 : index
    %4 = vector.load %arg4[%c0_5, %c0_6] : memref<8x4xf32, #tpu.memory_space<vmem>>, vector<8x4xf32>
    %cst = arith.constant dense<0.000000e+00> : vector<8x256xf32>
    %5 = tpu.matmul %4, %1, %cst {dimension_numbers = #tpu.dot_dimension_numbers<[1], [0], [0], [1], [0, 0, 1, 1], [], []>} : vector<8x4xf32>, vector<4x256xf32>, vector<8x256xf32> -> vector<8x256xf32>
    %c0_7 = arith.constant 0 : index
    %c0_8 = arith.constant 0 : index
    %6 = vector.load %arg5[%c0_7, %c0_8] : memref<8x1xf32, #tpu.memory_space<vmem>>, vector<8x1xf32>
    %7 = vector.broadcast %6 : vector<8x1xf32> to vector<8x256xf32>
    %8 = arith.addf %5, %7 : vector<8x256xf32>
    %c0_9 = arith.constant 0 : index
    %c0_10 = arith.constant 0 : index
    %9 = vector.load %arg6[%c0_9, %c0_10] : memref<8x6xf32, #tpu.memory_space<vmem>>, vector<8x6xf32>
    %cst_11 = arith.constant dense<0.000000e+00> : vector<8x256xf32>
    %10 = tpu.matmul %9, %3, %cst_11 {dimension_numbers = #tpu.dot_dimension_numbers<[1], [0], [0], [1], [0, 0, 1, 1], [], []>} : vector<8x6xf32>, vector<6x256xf32>, vector<8x256xf32> -> vector<8x256xf32>
    %c0_12 = arith.constant 0 : index
    %c0_13 = arith.constant 0 : index
    %11 = vector.load %arg7[%c0_12, %c0_13] : memref<8x1xf32, #tpu.memory_space<vmem>>, vector<8x1xf32>
    %12 = vector.broadcast %11 : vector<8x1xf32> to vector<8x256xf32>
    %13 = arith.addf %10, %12 : vector<8x256xf32>
    %14 = arith.addf %13, %8 : vector<8x256xf32>
    %cst_14 = arith.constant 0.000000e+00 : f32
    %15 = vector.broadcast %cst_14 : f32 to vector<8x256xf32>
    %16 = arith.maximumf %14, %15 : vector<8x256xf32>
    %c0_15 = arith.constant 0 : index
    %c0_16 = arith.constant 0 : index
    %17 = vector.load %arg8[%c0_15, %c0_16] : memref<8x1xf32, #tpu.memory_space<vmem>>, vector<8x1xf32>
    %18 = vector.broadcast %17 : vector<8x1xf32> to vector<8x256xf32>
    %19 = arith.mulf %16, %18 : vector<8x256xf32>
    %cst_17 = arith.constant dense<0.000000e+00> : vector<256xf32>
    %20 = vector.multi_reduction <add>, %19, %cst_17 [0] : vector<8x256xf32> to vector<256xf32>
    %21 = vector.shape_cast %20 : vector<256xf32> to vector<1x256xf32>
    %c0_18 = arith.constant 0 : index
    %c0_19 = arith.constant 0 : index
    %22 = vector.load %arg9[%c0_18, %c0_19] : memref<1x1xf32, #tpu.memory_space<vmem>>, vector<1x1xf32>
    %23 = vector.broadcast %22 : vector<1x1xf32> to vector<1x256xf32>
    %24 = arith.addf %21, %23 : vector<1x256xf32>
    %25 = arith.negf %24 : vector<1x256xf32>
    %26 = math.exp %25 : vector<1x256xf32>
    %cst_20 = arith.constant 1.000000e+00 : f32
    %27 = vector.broadcast %cst_20 : f32 to vector<1x256xf32>
    %28 = arith.addf %27, %26 : vector<1x256xf32>
    %29 = arith.divf %27, %28 : vector<1x256xf32>
    %30 = vector.broadcast %29 : vector<1x256xf32> to vector<4x256xf32>
    %31 = arith.mulf %1, %30 : vector<4x256xf32>
    %c0_21 = arith.constant 0 : index
    %c0_22 = arith.constant 0 : index
    %c0_23 = arith.constant 0 : index
    %32 = vector.load %arg10[%c0_21, %c0_22, %c0_23] : memref<1x4x256xf32, #tpu.memory_space<vmem>>, vector<1x4x256xf32>
    %33 = vector.shape_cast %32 : vector<1x4x256xf32> to vector<4x256xf32>
    %34 = vector.shape_cast %31 : vector<4x256xf32> to vector<1x4x256xf32>
    tpu.vector_store %arg10[%c0_21, %c0_22, %c0_23], %34 {strides = array<i32>} : memref<1x4x256xf32, #tpu.memory_space<vmem>>, vector<1x4x256xf32>,
    return
  }
  func.func @transform_0(%arg0: i32, %arg1: i32) -> (i32, i32, i32) {
    %c0_i32 = arith.constant 0 : i32
    %c0_i32_0 = arith.constant 0 : i32
    return %arg0, %c0_i32, %arg1 : i32, i32, i32
  }
  func.func @transform_1(%arg0: i32, %arg1: i32) -> (i32, i32, i32) {
    %c0_i32 = arith.constant 0 : i32
    %c0_i32_0 = arith.constant 0 : i32
    return %arg0, %c0_i32, %arg1 : i32, i32, i32
  }
  func.func @transform_2(%arg0: i32, %arg1: i32) -> (i32, i32) {
    %c0_i32 = arith.constant 0 : i32
    %c0_i32_0 = arith.constant 0 : i32
    %c0_i32_1 = arith.constant 0 : i32
    return %c0_i32, %c0_i32_0 : i32, i32
  }
  func.func @transform_3(%arg0: i32, %arg1: i32) -> (i32, i32) {
    %c0_i32 = arith.constant 0 : i32
    %c0_i32_0 = arith.constant 0 : i32
    %c0_i32_1 = arith.constant 0 : i32
    return %c0_i32, %c0_i32_0 : i32, i32
  }
  func.func @transform_4(%arg0: i32, %arg1: i32) -> (i32, i32) {
    %c0_i32 = arith.constant 0 : i32
    %c0_i32_0 = arith.constant 0 : i32
    %c0_i32_1 = arith.constant 0 : i32
    return %c0_i32, %c0_i32_0 : i32, i32
  }
  func.func @transform_5(%arg0: i32, %arg1: i32) -> (i32, i32) {
    %c0_i32 = arith.constant 0 : i32
    %c0_i32_0 = arith.constant 0 : i32
    %c0_i32_1 = arith.constant 0 : i32
    return %c0_i32, %c0_i32_0 : i32, i32
  }
  func.func @transform_6(%arg0: i32, %arg1: i32) -> (i32, i32) {
    %c0_i32 = arith.constant 0 : i32
    %c0_i32_0 = arith.constant 0 : i32
    %c0_i32_1 = arith.constant 0 : i32
    return %c0_i32, %c0_i32_0 : i32, i32
  }
  func.func @transform_7(%arg0: i32, %arg1: i32) -> (i32, i32) {
    %c0_i32 = arith.constant 0 : i32
    %c0_i32_0 = arith.constant 0 : i32
    %c0_i32_1 = arith.constant 0 : i32
    return %c0_i32, %c0_i32_0 : i32, i32
  }
  func.func @transform_8(%arg0: i32, %arg1: i32) -> (i32, i32, i32) {
    %c0_i32 = arith.constant 0 : i32
    %c0_i32_0 = arith.constant 0 : i32
    return %arg0, %c0_i32, %arg1 : i32, i32, i32
  }
}

</mosaic_0001>

<bundles_post_ra>
// kernel: tpu_custom_call.1
= control target key start
LH: loop header
LB: loop body
LE: loop exit
PB: predicated region body
PF: predicated region fallthrough
CT: control target
= control target key end

     0   :  { %s1043_s0 = inlined_call_operand.vmem [shape: f32[2,4,256], index: 0, kind: input, shape index: {}]   ;;  %s1044_s1 = inlined_call_operand.vmem [shape: f32[2,6,256], index: 1, kind: input, shape index: {}]   ;;  %s1045_s2 = inlined_call_operand.vmem [shape: f32[8,4], index: 2, kind: input, shape index: {}]   ;;  %s1046_s3 = inlined_call_operand.vmem [shape: f32[8,1], index: 3, kind: input, shape index: {}]   ;;  %s1047_s4 = inlined_call_operand.vmem [shape: f32[8,6], index: 4, kind: input, shape index: {}]   ;;  %s1048_s5 = inlined_call_operand.vmem [shape: f32[8,1], index: 5, kind: input, shape index: {}]   ;;  %s1049_s6 = inlined_call_operand.vmem [shape: f32[8,1], index: 6, kind: input, shape index: {}]   ;;  %s1050_s7 = inlined_call_operand.<no memory space> [shape: f32[1,1], index: 7, kind: input, shape index: {}]   ;;  %s1051_s8 = inlined_call_operand.hbm [shape: f32[2,4,256], index: 8, kind: output, shape index: {}]  }
   0x1   :  { %v13_v0 = vstv %s1050_s7 }
   0x2   :  { %14 = vst [vmem:[#allocation2] sm:$0x1] %v13_v0 }
   0x3   :  { %15 = vsyncpa [#allocation4], 0 }
   0x4   :  { %17 = vsyncpa [#allocation4 + $0x1], 0  ;;  %s908_s29 = smov 0   ;;  %s910_s30 = smov 0  }
   0x5   :  { %s912_s9 = smov 0   ;;  %s914_s10 = smov 0  }
   0x6   :  { %s916_s11 = smov 0   ;;  %s918_s12 = smov 0  }
   0x7 LB: > { %s685_s7 = sadd.s32 4294967295, %s857_s12   ;;  %s686_s13 = sadd.s32 4294967294, %s857_s12   ;;  %s857_s12 = sphi %s918_s12, %s23_s12   ;;  %s853_s11 = sphi %s916_s11, %s1060_s11   ;;  %s849_s10 = sphi %s914_s10, %s1059_s10   ;;  %s845_s9 = sphi %s912_s9, %s1058_s9   ;;  %s841_s30 = sphi %s910_s30, %s1057_s30   ;;  %s837_s29 = sphi %s908_s29, %s1056_s29  }
   0x8   : > { %s35_s14 = sadd.s32 1, %s853_s11  ;;  %s226_s15 = sadd.s32 1, %s845_s9 }
   0x9   : > { %p37_p0 = scmp.ge.s32.totalorder %s35_s14, 2  ;;  %p236_p1 = scmp.ne.s32.totalorder %s845_s9, %s841_s30 }
   0xa   : > { %p237_p2 = scmp.eq.s32.totalorder %s685_s7, 1  ;;  %p242_p3 = scmp.ne.s32.totalorder %s841_s30, %s837_s29 }
   0xb   : > { %s1062_s14 = smov (%p37_p0, %s35_s14), 0  ;;  %p243_p5 = scmp.eq.s32.totalorder %s686_s13, 1 }
   0xc   : > { %p948_p4 = por %p237_p2, %p236_p1  ;;  %s221_s17 = ssub.s32 %s853_s11, %s1062_s14 }
   0xd   : > { %p689_p6 = scmp.ge.s32.totalorder %s857_s12, 1  ;;  %p224_p7 = scmp.eq.s32.totalorder %s221_s17, 0 }
   0xe   : > { %p955_p8 = por %p243_p5, %p242_p3  ;;  %p305_p9 = scmp.lt.s32.totalorder %s857_s12, 3 }
   0xf   : > { %s961_s19 = scalar_select %p224_p7, %s845_s9, %s226_s15  }
  0x10   : > { %p306_p10 = pnand %p689_p6, %p305_p9 }
  0x11   : > { %p353_p11 = scmp.lt.s32.totalorder (!%p306_p10), %s849_s10, 1  ;;  %s712_s28 = sshll.u32 (!%p306_p10), %s849_s10, 3 }
  0x12   : > { %309 = sbr.rel (%p306_p10) target bundleno = 222 (0xde), region = 52  ;;  %s586_s15 = scalar_lea.hbm (!%p306_p10), %s1051_s8, %s712_s28 }
  0x13   : > { %s590_s20 = sshll.u32 (!%p306_p10), %s586_s15, 4  ;;  %s591_s20 = int_to_ptr.hbm [resolvable:$true] %s590_s20 }
  0x14   : > { %s793_s22 = sshra.s32 (!%p306_p10), %s591_s20, 4  ;;  %s794_s22 = int_to_ptr.hbm [resolvable:$true] %s793_s22 }
  0x15   : > { %s795_s23 = scalar_lea.hbm (!%p306_p10), %s794_s22, 8  ;;  %p800_p1 = scmp.lt.s32.totalorder (!%p306_p10), %s794_s22, %s1051_s8 }
  0x16   : > { %p796_p12 = scmp.ne.s32.totalorder (!%p306_p10), %s794_s22, %s795_s23 }
  0x17   : > { %v377_v1 = vld [vmem:[%s1046_s3] sm:$0xff]  ;;  %v859_v2 = vmov 0   ;;  %s354_s24 = scalar_select %p353_p11, %s849_s10, 1  ;;  %vm447_vm0 = vcmask 1045504   ;;  %vm443_vm1 = vcmask 48128   ;;  %vm391_vm2 = vcmask 1043456  }
  0x18   : > { %769 = vset.pattern.permute.xlu0 %v859_v2  ;;  %770 = vset.pattern.permute.xlu1 %v859_v2  ;;  %v498_v3 = vld [vmem:[%s1049_s6] sm:$0xff]  ;;  %v518_v9 = vld [vmem:[#allocation2] sm:$0x1]  ;;  %vm387_vm3 = vcmask 31744   ;;  %p797_p13 = pnand %p796_p12, %p948_p4 }
  0x19   : > { %380 = vperm.xlu0 %769, %v377_v1   ;;  %501 = vperm.xlu1 %770, %v498_v3   ;;  %s710_s25 = sshll.u32 %s354_s24, 3  ;;  %s711_s26 = sshll.u32 %s354_s24, 4  ;;  %v436_v4 = vld [vmem:[%s1047_s4] sm:$0xff] }
  0x1a   : > { %s360_s7 = scalar_lea.vmem %s1043_s0, %s710_s25  ;;  %s370_s17 = scalar_lea.vmem %s1044_s1, %s711_s26  ;;  %v437_v8 = vld [vmem:[%s1048_s5] sm:$0xff] }
  0x1b   : > { %v980_v5 = vld [vmem:[%s360_s7] sm:$0xff]  ;;  %v375_v7 = vld [vmem:[%s370_s17 + $0x8] sm:$0x3f]  ;;  %s349_s26 = sand.u32 1, %s841_s30   ;;  %p798_p0 = pneg %p797_p13 }
  0x1c   : > { %v374_v6 = vld [vmem:[%s370_s17] sm:$0x3f]  ;;  %384 = vst [vmem:[#allocation1] ss:$2 sm:$0xff] %v980_v5  ;;  %701 = vmatpush.msk.msra.mxu3 %vm447_vm0, %v375_v7  ;;  %s994_s27 = sshll.u32 %s349_s26, 3  ;;  %s573_s21 = scalar_lea.sflag [#allocation4], %s349_s26 }
  0x1d   : > { %699 = vmatpush.msk.msra.mxu2 %vm447_vm0, %v374_v6  ;;  %702 = vmatmul.msk.f32.vlgmr.msra.gmra.mxu3 %vm443_vm1, %v436_v4  ;;  %v376_v10 = vld [vmem:[%s1045_s2] sm:$0xff]  ;;  %s351_s10 = scalar_lea.vmem [#allocation3], %s994_s27  ;;  %s799_s27 = scalar_lea.hbm %s1051_s8, 16 }
  0x1e   : > { %700 = vmatmul.msk.f32.vlgmr.msra.gmra.mxu2 %vm443_vm1, %v436_v4  ;;  %s588_s17 = sshll.u32 %s351_s10, 4  ;;  %p801_p2 = scmp.lt.s32.totalorder %s799_s27, %s795_s23  ;;  %s589_s17 = int_to_ptr.vmem [resolvable:$true] %s588_s17 }
  0x20   : > { %p802_p3 = por %p801_p2, %p800_p1 }
  0x21   : > { %440 = vperm.xlu0 %769, %v437_v8   ;;  %521 = vperm.xlu1 %770, %v518_v9  }
  0x22   : > { %p803_p5 = pnand %p802_p3, %p798_p0 }
  0x23   : > { %v385_v11 = vld.sshfl [vmem:[#allocation1] sm:$0xff pattern:$0x75316420]  ;;  %v386_v12 = vld.sshfl [vmem:[#allocation1 + $0x8] sm:$0xff pattern:$0x75316420] }
  0x24   : > { %695 = vmatpush.msk.msra.mxu0 %vm391_vm2, %v385_v11  ;;  %697 = vmatpush.msk.msra.mxu1 %vm391_vm2, %v386_v12 }
  0x25   : > { %696 = vmatmul.msk.f32.vlgmr.msra.gmra.mxu0 %vm387_vm3, %v376_v10  ;;  %698 = vmatmul.msk.f32.vlgmr.msra.gmra.mxu1 %vm387_vm3, %v376_v10 }
  0x8b   : > { %v381_v13 = vpop.permute.xlu0 %380  ;;  %v502_v27 = vpop.permute.xlu1 %501 }
  0x93   : > { %v441_v16 = vpop.permute.xlu0 %440  ;;  %v522_v38 = vpop.permute.xlu1 %521 }
  0x94   : > { %v524_v43 = vperm.slane %v522_v38, 0 }
  0xa0   : > { %v491_v15 = vpop.f32.mrf.mxu3 }
  0xa1   : > { %v471_v14 = vpop.f32.mrf.mxu2  ;;  %v492_v20 = vadd.f32 %v491_v15, %v441_v16 }
  0xa2   : > { %v413_v17 = vpop.f32.mrf.mxu0  ;;  %v433_v18 = vpop.f32.mrf.mxu1  ;;  %v472_v19 = vadd.f32 %v471_v14, %v441_v16 }
  0xa3   : > { %v414_v21 = vadd.f32 %v413_v17, %v381_v13  ;;  %v434_v22 = vadd.f32 %v433_v18, %v381_v13 }
  0xa5   : > { %v494_v23 = vadd.f32 %v472_v19, %v414_v21  ;;  %v495_v24 = vadd.f32 %v492_v20, %v434_v22 }
  0xa7   : > { %v496_v25 = vmax.f32 %v494_v23, 0.0  ;;  %v497_v26 = vmax.f32 %v495_v24, 0.0 }
  0xa9   : > { %v504_v28 = vmul.f32 %v502_v27, %v496_v25  ;;  %v505_v29 = vmul.f32 %v502_v27, %v497_v26 }
  0xab   : > { %v506_v30 = vrot.slane %v504_v28, 4  ;;  %v512_v31 = vrot.slane %v505_v29, 4 }
  0xad   : > { %v507_v32 = vadd.f32 %v506_v30, %v504_v28  ;;  %v513_v33 = vadd.f32 %v512_v31, %v505_v29 }
  0xaf   : > { %v508_v34 = vrot.slane %v507_v32, 2  ;;  %v514_v35 = vrot.slane %v513_v33, 2 }
  0xb1   : > { %v509_v36 = vadd.f32 %v508_v34, %v507_v32  ;;  %v515_v37 = vadd.f32 %v514_v35, %v513_v33 }
  0xb3   : > { %v510_v39 = vrot.slane %v509_v36, 1  ;;  %v516_v40 = vrot.slane %v515_v37, 1 }
  0xb5   : > { %v511_v41 = vadd.f32 %v510_v39, %v509_v36  ;;  %v517_v42 = vadd.f32 %v516_v40, %v515_v37 }
  0xb7   : > { %v525_v44 = vadd.f32 %v524_v43, %v511_v41  ;;  %v526_v45 = vadd.f32 %v524_v43, %v517_v42 }
  0xb9   : > { %v703_v46 = vmul.f32 -1.442695, %v525_v44  ;;  %v704_v47 = vmul.f32 -1.442695, %v526_v45 }
  0xbb   : > { %771 = vpow2.f32 %v703_v46 }
  0xbc   : > { %773 = vpow2.f32 %v704_v47 }
  0xc1   : > { %v772_v48 = vpop.eup %771 }
  0xc2   : > { %v774_v49 = vpop.eup %773  ;;  %v533_v50 = vadd.f32 1.0, %v772_v48 }
  0xc3   : > { %v534_v51 = vadd.f32 1.0, %v774_v49 }
  0xc4   : > { %775 = vrcp.f32 %v533_v50  ;;  %vm540_vm6 = vweird.f32 %v533_v50  ;;  %v546_v63 = vand.u32 2147483648, %v533_v50  ;;  %v544_v1 = vand.u32 2147483647, %v533_v50 }
  0xc5   : > { %777 = vrcp.f32 %v534_v51  ;;  %v561_v59 = vand.u32 2147483648, %v534_v51  ;;  %v559_v61 = vand.u32 2147483647, %v534_v51  ;;  %vm555_vm8 = vweird.f32 %v534_v51 }
  0xc6   : > { %v547_v7 = vor.u32 1.1754944e-38, %v546_v63  ;;  %vm545_vm11 = vcmp.eq.f32.partialorder %v544_v1, 8.507059e+37 }
  0xc7   : > { %v562_v3 = vor.u32 1.1754944e-38, %v561_v59  ;;  %vm560_vm10 = vcmp.eq.f32.partialorder %v559_v61, 8.507059e+37 }
  0xca   : > { %v776_v52 = vpop.eup %775 }
  0xcb   : > { %v778_v53 = vpop.eup %777  ;;  %v536_v54 = vmul.f32 %v776_v52, %v533_v50  ;;  %vm541_vm4 = vweird.f32 %v776_v52 }
  0xcc   : > { %v551_v55 = vmul.f32 %v778_v53, %v534_v51  ;;  %vm556_vm5 = vweird.f32 %v778_v53  ;;  %vm997_vm7 = vmor %vm540_vm6, %vm541_vm4 }
  0xcd   : > { %v537_v56 = vsub.f32 1.0, %v536_v54  ;;  %vm557_vm9 = vmor %vm555_vm8, %vm556_vm5 }
  0xce   : > { %v552_v57 = vsub.f32 1.0, %v551_v55 }
  0xcf   : > { %v538_v58 = vmul.f32 %v776_v52, %v537_v56 }
  0xd0   : > { %v553_v60 = vmul.f32 %v778_v53, %v552_v57 }
  0xd1   : > { %v539_v62 = vadd.f32 %v776_v52, %v538_v58 }
  0xd2   : > { %v554_v2 = vadd.f32 %v778_v53, %v553_v60 }
  0xd3   : > { %v543_v4 = vsel %vm997_vm7, %v776_v52, %v539_v62 }
  0xd4   : > { %v558_v6 = vsel %vm557_vm9, %v778_v53, %v554_v2  ;;  %v548_v10 = vsel %vm545_vm11, %v547_v7, %v543_v4 }
  0xd5   : > { %v563_v8 = vsel %vm560_vm10, %v562_v3, %v558_v6 }
  0xd6   : > { %v567_v9 = vrot.slane %v563_v8, 4 }
  0xd8   : > { %v568_v11 = vsel %vm391_vm2, %v548_v10, %v567_v9 }
  0xd9   : > { %v570_v12 = vmul.f32 %v568_v11, %v980_v5 }
  0xdb   : > { %571 = vst [vmem:[%s351_s10] sm:$0xff] %v570_v12 }
  0xdc   : > { %806 = shalt.err (!%p803_p5)
}
  0xdd   : > { %713 = dma.vmem_to_hbm [thread:$0]  (%p948_p4), %s589_s17, 128, %s591_s20, %s573_s21  }
  0xde PF: > { %p719_p6 = scmp.ge.s32.totalorder %s857_s12, 2  ;;  %s602_s26 = sand.u32 1, %s837_s29  }
  0xdf   : > { %s603_s13 = scalar_lea.sflag [#allocation4], %s602_s26 }
  0xe0   : > { %p716_p7 = pnand %p719_p6, %p955_p8 }
  0xe2   : > { %p717_p9 = pneg %p716_p7 }
  0xe4   : > { %832 = dma.done.wait (%p717_p9), %s603_s13, 128  }
  0xe5   : > { %834 = vsyncadd (%p717_p9), %s603_s13, 4294967168  ;;  %s23_s12 = sadd.s32 1, %s857_s12   ;;  %s1056_s29 = smov %s841_s30 }
  0xe6   : > { %p20_p10 = scmp.ge.s32.totalorder %s23_s12, 4   ;;  %s1057_s30 = smov %s845_s9 }
  0xe7   : > { %s1058_s9 = smov %s961_s19  ;;  %s1059_s10 = smov %s853_s11 }
  0xe8   : > { %s1060_s11 = smov %s1062_s14  ;;  %22 = sbr.rel (!%p20_p10) target bundleno = 7 (0x7), region = 90 }
  0xed   :  { %609 = vsyncpa [#allocation4], 1 }
  0xee   :  { %611 = vsyncpa [#allocation4 + $0x1], 1 }

</bundles_post_ra>
